<compile_context>
chip_gen: v5e
topology: v5e:2x2
jax: 0.10.0
libtpu: 0.0.40
codegen_flags: <defaults>
</compile_context>

<pallas_src>
import math
from functools import partial

import jax
import jax.numpy as jnp
from jax.experimental import pallas as pl
from jax.experimental.pallas import tpu as pltpu

# Small, test-friendly sizes (real experiment: n_samples = 2**15, table = 512).
N_SAMPLES = 256
TABLE_SIZE = 128
TILE_N = 128      # production: sweep 1024-4096
STRIPE = 8        # sublane-stripe height of the fused accumulate

_STD = 0.01
_EPS_DIST = 1e-8                      # epsilon added to the Normal std
_EPS_NORM = 1e-8                      # max_norm epsilon (exact, via hoisted norm)
_SIGMA = _STD + _EPS_DIST
_K = 1.0 / (_SIGMA * math.sqrt(2.0))              # core = -((rng - mu) * K)^2
_C = 1.0 / (_SIGMA * math.sqrt(2.0 * math.pi))    # Normal norm const: win = C*exp(core)


def _wavetable_kernel(pos_ref, a_ref, table_ref, out_ref, *, table_size, stripe):
    # pos_ref:   (1, TILE_N)     f32  window means (lane axis = sample index)
    # a_ref:     (TABLE_SIZE, 1) f32  pre-scaled grid column: linspace(0,1,T) * K
    # table_ref: (TABLE_SIZE, 1) f32  sin wavetable as a column
    # out_ref:   (1, TILE_N)     f32  lane-dense output row
    tile_n = pos_ref.shape[-1]
    n_stripes = table_size // stripe

    mu = pos_ref[...]                                   # (1, TILE_N)
    b_row = mu * _K                                     # pre-scaled means
    # Hoist the (loop-invariant) sublane broadcast out of the stripe loop.
    b_slab = jnp.broadcast_to(b_row, (stripe, tile_n))  # (STRIPE, TILE_N)

    # Fused window synthesis + wavetable contraction: no (T, TILE_N) slab is
    # materialised / stored / re-read, and no M=1 MXU matvec.
    # Per element: d = a - b ; w = exp(-(d*d)) ; acc += table * w
    acc = jnp.zeros((stripe, tile_n), dtype=jnp.float32)
    for s in range(n_stripes):          # static trip count; temps die per iter
        sl = pl.ds(s * stripe, stripe)
        a_col = a_ref[sl, :]            # (STRIPE, 1)
        tbl_col = table_ref[sl, :]      # (STRIPE, 1)
        d = a_col - b_slab              # (STRIPE, TILE_N)
        w = jnp.exp(-(d * d))           # unnormalised window values / C
        acc = acc + tbl_col * w

    s_row = jnp.sum(acc, axis=0, keepdims=True)         # (1, TILE_N)

    # Hoisted max-normalisation on the (1, TILE_N) row only.  max_t windows is
    # attained at the grid point nearest to mu -> analytic, no slab reduce.
    t_near = jnp.floor(mu * (table_size - 1.0) + 0.5)   # nearest grid index
    a_near = t_near * (_K / (table_size - 1.0))         # = rng[t_near] * K (±1 ulp)
    d_near = a_near - b_row
    max_w = _C * jnp.exp(-(d_near * d_near))            # = max_t windows[t, n]
    # Exact divide on the tiny row; pl.reciprocal(approx=True) is an option if
    # the tolerance budget ever allows it.
    out_ref[...] = (_C * s_row) / (max_w + _EPS_NORM)


def wavetable_forward(x, f0, table, *, n_samples=N_SAMPLES, table_size=TABLE_SIZE,
                      tile_n=TILE_N, stripe=STRIPE):
    """x is unused by the PyTorch forward (kept for signature parity)."""
    del x
    assert n_samples % tile_n == 0, (n_samples, tile_n)
    assert table_size % stripe == 0, (table_size, stripe)

    # ---- plain-JAX glue (matches torch ops exactly, incl. f32 cumsum) ----
    f0_abs = jnp.abs(f0)                                    # (1, 1)
    pos = jnp.tile(f0_abs, (1, n_samples))                  # (1, n_samples)
    pos = jnp.mod(jnp.cumsum(pos, axis=-1), 1.0)            # fmod(a, 1), a >= 0
    pos = pos.astype(jnp.float32)                           # lane-dense row

    rng = jnp.linspace(0.0, 1.0, table_size, dtype=jnp.float32)   # exact torch parity
    a_col = (rng * _K).astype(jnp.float32).reshape(table_size, 1)
    table_col = table.reshape(table_size, 1).astype(jnp.float32)

    # ---- Pallas hot path: fused window synthesis + contraction + norm ----
    kernel = partial(_wavetable_kernel, table_size=table_size, stripe=stripe)
    out = pl.pallas_call(
        kernel,
        out_shape=jax.ShapeDtypeStruct((1, n_samples), jnp.float32),
        grid_spec=pltpu.PrefetchScalarGridSpec(
            num_scalar_prefetch=0,
            grid=(n_samples // tile_n,),
            in_specs=[
                pl.BlockSpec((1, tile_n), lambda i: (0, i)),       # pos row (lane-dense)
                pl.BlockSpec((table_size, 1), lambda i: (0, 0)),   # scaled rng column (grid-invariant)
                pl.BlockSpec((table_size, 1), lambda i: (0, 0)),   # sin table column (grid-invariant)
            ],
            out_specs=pl.BlockSpec((1, tile_n), lambda i: (0, i)), # lane-dense output
        ),
        compiler_params=pltpu.CompilerParams(
            dimension_semantics=("parallel",),
        ),
    )(pos, a_col, table_col)

    return out.reshape(1, 1, n_samples)


def _reference_forward(x, f0, table):
    """Pure-JAX reference mirroring the PyTorch forward."""
    del x
    f0_abs = jnp.abs(f0)
    pos = jnp.tile(f0_abs, (1, N_SAMPLES))
    pos = jnp.mod(jnp.cumsum(pos, axis=-1), 1.0).reshape(1, N_SAMPLES, 1)
    rng = jnp.linspace(0.0, 1.0, TABLE_SIZE).reshape(1, 1, TABLE_SIZE)
    sigma = _STD + _EPS_DIST
    log_prob = (-0.5 * ((rng - pos) / sigma) ** 2
                - jnp.log(sigma) - 0.5 * jnp.log(2.0 * jnp.pi))
    windows = jnp.exp(log_prob)
    mx = jnp.max(jnp.abs(windows), axis=-1, keepdims=True)
    windows = windows / (mx + _EPS_NORM)
    sig = windows @ table.reshape(TABLE_SIZE, 1)
    return sig.reshape(1, 1, N_SAMPLES)


if __name__ == "__main__":
    key = jax.random.PRNGKey(0)
    k_f0, k_x = jax.random.split(key)

    # Deterministic parameter init: f0 ~ U(0, 1), shape (1, 1).
    f0 = jax.random.uniform(k_f0, (1, 1), dtype=jnp.float32)
    # Registered buffer: sin wavetable, shape (1, TABLE_SIZE).
    table = jnp.sin(
        jnp.linspace(-math.pi, math.pi, TABLE_SIZE, dtype=jnp.float32)
    ).reshape(1, TABLE_SIZE)

    # x is unused by the forward pass; small dummy for signature parity.
    x = jax.random.normal(k_x, (1, 1, N_SAMPLES), dtype=jnp.float32)

    out = wavetable_forward(x, f0, table)
    out = jax.block_until_ready(out)

    ref = _reference_forward(x, f0, table)
    assert out.shape == (1, 1, N_SAMPLES), out.shape
    assert jnp.allclose(out, ref, atol=1e-4, rtol=1e-4), "mismatch vs reference"

    print("KERNEL_OK")
</pallas_src>

<mosaic_0001>
module attributes {stable_mosaic.version = 11 : i64} {
  func.func @_wavetable_kernel(%arg0: i32, %arg1: memref<1x128xf32, #tpu.memory_space<vmem>>, %arg2: memref<128x1xf32, #tpu.memory_space<vmem>>, %arg3: memref<128x1xf32, #tpu.memory_space<vmem>>, %arg4: memref<1x128xf32, #tpu.memory_space<vmem>>) attributes {dimension_semantics = [#tpu.dimension_semantics<parallel>], iteration_bounds = array<i64: 2>, scalar_prefetch = 0 : i64, scratch_operands = 0 : i64, tpu.core_type = #tpu.core_type<tc>, window_params = [{transform_indices = @transform_0, window_bounds = array<i64: 1, 128>}, {pipeline_mode = #tpu.pipeline_mode<synchronous>, transform_indices = @transform_1, window_bounds = array<i64: 128, 1>}, {pipeline_mode = #tpu.pipeline_mode<synchronous>, transform_indices = @transform_2, window_bounds = array<i64: 128, 1>}, {transform_indices = @transform_3, window_bounds = array<i64: 1, 128>}]} {
    %c0 = arith.constant 0 : index
    %c0_0 = arith.constant 0 : index
    %0 = vector.load %arg1[%c0, %c0_0] : memref<1x128xf32, #tpu.memory_space<vmem>>, vector<1x128xf32>
    %cst = arith.constant 70.7106094 : f32
    %1 = vector.broadcast %cst : f32 to vector<1x128xf32>
    %2 = arith.mulf %0, %1 : vector<1x128xf32>
    %3 = vector.shape_cast %2 : vector<1x128xf32> to vector<1x128xf32>
    %4 = vector.broadcast %3 : vector<1x128xf32> to vector<8x128xf32>
    %cst_1 = arith.constant 0.000000e+00 : f32
    %5 = vector.broadcast %cst_1 : f32 to vector<8x128xf32>
    %c0_2 = arith.constant 0 : index
    %c0_3 = arith.constant 0 : index
    %6 = vector.load %arg2[%c0_2, %c0_3] : memref<128x1xf32, #tpu.memory_space<vmem>>, vector<8x1xf32>
    %c0_4 = arith.constant 0 : index
    %c0_5 = arith.constant 0 : index
    %7 = vector.load %arg3[%c0_4, %c0_5] : memref<128x1xf32, #tpu.memory_space<vmem>>, vector<8x1xf32>
    %8 = vector.broadcast %6 : vector<8x1xf32> to vector<8x128xf32>
    %9 = arith.subf %8, %4 : vector<8x128xf32>
    %10 = arith.mulf %9, %9 : vector<8x128xf32>
    %cst_6 = arith.constant 0.000000e+00 : f32
    %11 = vector.broadcast %cst_6 : f32 to vector<8x128xf32>
    %12 = arith.subf %11, %10 : vector<8x128xf32>
    %13 = math.exp %12 : vector<8x128xf32>
    %14 = vector.broadcast %7 : vector<8x1xf32> to vector<8x128xf32>
    %15 = arith.mulf %14, %13 : vector<8x128xf32>
    %16 = arith.addf %5, %15 : vector<8x128xf32>
    %c8 = arith.constant 8 : index
    %c0_7 = arith.constant 0 : index
    %17 = vector.load %arg2[%c8, %c0_7] : memref<128x1xf32, #tpu.memory_space<vmem>>, vector<8x1xf32>
    %c8_8 = arith.constant 8 : index
    %c0_9 = arith.constant 0 : index
    %18 = vector.load %arg3[%c8_8, %c0_9] : memref<128x1xf32, #tpu.memory_space<vmem>>, vector<8x1xf32>
    %19 = vector.broadcast %17 : vector<8x1xf32> to vector<8x128xf32>
    %20 = arith.subf %19, %4 : vector<8x128xf32>
    %21 = arith.mulf %20, %20 : vector<8x128xf32>
    %cst_10 = arith.constant 0.000000e+00 : f32
    %22 = vector.broadcast %cst_10 : f32 to vector<8x128xf32>
    %23 = arith.subf %22, %21 : vector<8x128xf32>
    %24 = math.exp %23 : vector<8x128xf32>
    %25 = vector.broadcast %18 : vector<8x1xf32> to vector<8x128xf32>
    %26 = arith.mulf %25, %24 : vector<8x128xf32>
    %27 = arith.addf %16, %26 : vector<8x128xf32>
    %c16 = arith.constant 16 : index
    %c0_11 = arith.constant 0 : index
    %28 = vector.load %arg2[%c16, %c0_11] : memref<128x1xf32, #tpu.memory_space<vmem>>, vector<8x1xf32>
    %c16_12 = arith.constant 16 : index
    %c0_13 = arith.constant 0 : index
    %29 = vector.load %arg3[%c16_12, %c0_13] : memref<128x1xf32, #tpu.memory_space<vmem>>, vector<8x1xf32>
    %30 = vector.broadcast %28 : vector<8x1xf32> to vector<8x128xf32>
    %31 = arith.subf %30, %4 : vector<8x128xf32>
    %32 = arith.mulf %31, %31 : vector<8x128xf32>
    %cst_14 = arith.constant 0.000000e+00 : f32
    %33 = vector.broadcast %cst_14 : f32 to vector<8x128xf32>
    %34 = arith.subf %33, %32 : vector<8x128xf32>
    %35 = math.exp %34 : vector<8x128xf32>
    %36 = vector.broadcast %29 : vector<8x1xf32> to vector<8x128xf32>
    %37 = arith.mulf %36, %35 : vector<8x128xf32>
    %38 = arith.addf %27, %37 : vector<8x128xf32>
    %c24 = arith.constant 24 : index
    %c0_15 = arith.constant 0 : index
    %39 = vector.load %arg2[%c24, %c0_15] : memref<128x1xf32, #tpu.memory_space<vmem>>, vector<8x1xf32>
    %c24_16 = arith.constant 24 : index
    %c0_17 = arith.constant 0 : index
    %40 = vector.load %arg3[%c24_16, %c0_17] : memref<128x1xf32, #tpu.memory_space<vmem>>, vector<8x1xf32>
    %41 = vector.broadcast %39 : vector<8x1xf32> to vector<8x128xf32>
    %42 = arith.subf %41, %4 : vector<8x128xf32>
    %43 = arith.mulf %42, %42 : vector<8x128xf32>
    %cst_18 = arith.constant 0.000000e+00 : f32
    %44 = vector.broadcast %cst_18 : f32 to vector<8x128xf32>
    %45 = arith.subf %44, %43 : vector<8x128xf32>
    %46 = math.exp %45 : vector<8x128xf32>
    %47 = vector.broadcast %40 : vector<8x1xf32> to vector<8x128xf32>
    %48 = arith.mulf %47, %46 : vector<8x128xf32>
    %49 = arith.addf %38, %48 : vector<8x128xf32>
    %c32 = arith.constant 32 : index
    %c0_19 = arith.constant 0 : index
    %50 = vector.load %arg2[%c32, %c0_19] : memref<128x1xf32, #tpu.memory_space<vmem>>, vector<8x1xf32>
    %c32_20 = arith.constant 32 : index
    %c0_21 = arith.constant 0 : index
    %51 = vector.load %arg3[%c32_20, %c0_21] : memref<128x1xf32, #tpu.memory_space<vmem>>, vector<8x1xf32>
    %52 = vector.broadcast %50 : vector<8x1xf32> to vector<8x128xf32>
    %53 = arith.subf %52, %4 : vector<8x128xf32>
    %54 = arith.mulf %53, %53 : vector<8x128xf32>
    %cst_22 = arith.constant 0.000000e+00 : f32
    %55 = vector.broadcast %cst_22 : f32 to vector<8x128xf32>
    %56 = arith.subf %55, %54 : vector<8x128xf32>
    %57 = math.exp %56 : vector<8x128xf32>
    %58 = vector.broadcast %51 : vector<8x1xf32> to vector<8x128xf32>
    %59 = arith.mulf %58, %57 : vector<8x128xf32>
    %60 = arith.addf %49, %59 : vector<8x128xf32>
    %c40 = arith.constant 40 : index
    %c0_23 = arith.constant 0 : index
    %61 = vector.load %arg2[%c40, %c0_23] : memref<128x1xf32, #tpu.memory_space<vmem>>, vector<8x1xf32>
    %c40_24 = arith.constant 40 : index
    %c0_25 = arith.constant 0 : index
    %62 = vector.load %arg3[%c40_24, %c0_25] : memref<128x1xf32, #tpu.memory_space<vmem>>, vector<8x1xf32>
    %63 = vector.broadcast %61 : vector<8x1xf32> to vector<8x128xf32>
    %64 = arith.subf %63, %4 : vector<8x128xf32>
    %65 = arith.mulf %64, %64 : vector<8x128xf32>
    %cst_26 = arith.constant 0.000000e+00 : f32
    %66 = vector.broadcast %cst_26 : f32 to vector<8x128xf32>
    %67 = arith.subf %66, %65 : vector<8x128xf32>
    %68 = math.exp %67 : vector<8x128xf32>
    %69 = vector.broadcast %62 : vector<8x1xf32> to vector<8x128xf32>
    %70 = arith.mulf %69, %68 : vector<8x128xf32>
    %71 = arith.addf %60, %70 : vector<8x128xf32>
    %c48 = arith.constant 48 : index
    %c0_27 = arith.constant 0 : index
    %72 = vector.load %arg2[%c48, %c0_27] : memref<128x1xf32, #tpu.memory_space<vmem>>, vector<8x1xf32>
    %c48_28 = arith.constant 48 : index
    %c0_29 = arith.constant 0 : index
    %73 = vector.load %arg3[%c48_28, %c0_29] : memref<128x1xf32, #tpu.memory_space<vmem>>, vector<8x1xf32>
    %74 = vector.broadcast %72 : vector<8x1xf32> to vector<8x128xf32>
    %75 = arith.subf %74, %4 : vector<8x128xf32>
    %76 = arith.mulf %75, %75 : vector<8x128xf32>
    %cst_30 = arith.constant 0.000000e+00 : f32
    %77 = vector.broadcast %cst_30 : f32 to vector<8x128xf32>
    %78 = arith.subf %77, %76 : vector<8x128xf32>
    %79 = math.exp %78 : vector<8x128xf32>
    %80 = vector.broadcast %73 : vector<8x1xf32> to vector<8x128xf32>
    %81 = arith.mulf %80, %79 : vector<8x128xf32>
    %82 = arith.addf %71, %81 : vector<8x128xf32>
    %c56 = arith.constant 56 : index
    %c0_31 = arith.constant 0 : index
    %83 = vector.load %arg2[%c56, %c0_31] : memref<128x1xf32, #tpu.memory_space<vmem>>, vector<8x1xf32>
    %c56_32 = arith.constant 56 : index
    %c0_33 = arith.constant 0 : index
    %84 = vector.load %arg3[%c56_32, %c0_33] : memref<128x1xf32, #tpu.memory_space<vmem>>, vector<8x1xf32>
    %85 = vector.broadcast %83 : vector<8x1xf32> to vector<8x128xf32>
    %86 = arith.subf %85, %4 : vector<8x128xf32>
    %87 = arith.mulf %86, %86 : vector<8x128xf32>
    %cst_34 = arith.constant 0.000000e+00 : f32
    %88 = vector.broadcast %cst_34 : f32 to vector<8x128xf32>
    %89 = arith.subf %88, %87 : vector<8x128xf32>
    %90 = math.exp %89 : vector<8x128xf32>
    %91 = vector.broadcast %84 : vector<8x1xf32> to vector<8x128xf32>
    %92 = arith.mulf %91, %90 : vector<8x128xf32>
    %93 = arith.addf %82, %92 : vector<8x128xf32>
    %c64 = arith.constant 64 : index
    %c0_35 = arith.constant 0 : index
    %94 = vector.load %arg2[%c64, %c0_35] : memref<128x1xf32, #tpu.memory_space<vmem>>, vector<8x1xf32>
    %c64_36 = arith.constant 64 : index
    %c0_37 = arith.constant 0 : index
    %95 = vector.load %arg3[%c64_36, %c0_37] : memref<128x1xf32, #tpu.memory_space<vmem>>, vector<8x1xf32>
    %96 = vector.broadcast %94 : vector<8x1xf32> to vector<8x128xf32>
    %97 = arith.subf %96, %4 : vector<8x128xf32>
    %98 = arith.mulf %97, %97 : vector<8x128xf32>
    %cst_38 = arith.constant 0.000000e+00 : f32
    %99 = vector.broadcast %cst_38 : f32 to vector<8x128xf32>
    %100 = arith.subf %99, %98 : vector<8x128xf32>
    %101 = math.exp %100 : vector<8x128xf32>
    %102 = vector.broadcast %95 : vector<8x1xf32> to vector<8x128xf32>
    %103 = arith.mulf %102, %101 : vector<8x128xf32>
    %104 = arith.addf %93, %103 : vector<8x128xf32>
    %c72 = arith.constant 72 : index
    %c0_39 = arith.constant 0 : index
    %105 = vector.load %arg2[%c72, %c0_39] : memref<128x1xf32, #tpu.memory_space<vmem>>, vector<8x1xf32>
    %c72_40 = arith.constant 72 : index
    %c0_41 = arith.constant 0 : index
    %106 = vector.load %arg3[%c72_40, %c0_41] : memref<128x1xf32, #tpu.memory_space<vmem>>, vector<8x1xf32>
    %107 = vector.broadcast %105 : vector<8x1xf32> to vector<8x128xf32>
    %108 = arith.subf %107, %4 : vector<8x128xf32>
    %109 = arith.mulf %108, %108 : vector<8x128xf32>
    %cst_42 = arith.constant 0.000000e+00 : f32
    %110 = vector.broadcast %cst_42 : f32 to vector<8x128xf32>
    %111 = arith.subf %110, %109 : vector<8x128xf32>
    %112 = math.exp %111 : vector<8x128xf32>
    %113 = vector.broadcast %106 : vector<8x1xf32> to vector<8x128xf32>
    %114 = arith.mulf %113, %112 : vector<8x128xf32>
    %115 = arith.addf %104, %114 : vector<8x128xf32>
    %c80 = arith.constant 80 : index
    %c0_43 = arith.constant 0 : index
    %116 = vector.load %arg2[%c80, %c0_43] : memref<128x1xf32, #tpu.memory_space<vmem>>, vector<8x1xf32>
    %c80_44 = arith.constant 80 : index
    %c0_45 = arith.constant 0 : index
    %117 = vector.load %arg3[%c80_44, %c0_45] : memref<128x1xf32, #tpu.memory_space<vmem>>, vector<8x1xf32>
    %118 = vector.broadcast %116 : vector<8x1xf32> to vector<8x128xf32>
    %119 = arith.subf %118, %4 : vector<8x128xf32>
    %120 = arith.mulf %119, %119 : vector<8x128xf32>
    %cst_46 = arith.constant 0.000000e+00 : f32
    %121 = vector.broadcast %cst_46 : f32 to vector<8x128xf32>
    %122 = arith.subf %121, %120 : vector<8x128xf32>
    %123 = math.exp %122 : vector<8x128xf32>
    %124 = vector.broadcast %117 : vector<8x1xf32> to vector<8x128xf32>
    %125 = arith.mulf %124, %123 : vector<8x128xf32>
    %126 = arith.addf %115, %125 : vector<8x128xf32>
    %c88 = arith.constant 88 : index
    %c0_47 = arith.constant 0 : index
    %127 = vector.load %arg2[%c88, %c0_47] : memref<128x1xf32, #tpu.memory_space<vmem>>, vector<8x1xf32>
    %c88_48 = arith.constant 88 : index
    %c0_49 = arith.constant 0 : index
    %128 = vector.load %arg3[%c88_48, %c0_49] : memref<128x1xf32, #tpu.memory_space<vmem>>, vector<8x1xf32>
    %129 = vector.broadcast %127 : vector<8x1xf32> to vector<8x128xf32>
    %130 = arith.subf %129, %4 : vector<8x128xf32>
    %131 = arith.mulf %130, %130 : vector<8x128xf32>
    %cst_50 = arith.constant 0.000000e+00 : f32
    %132 = vector.broadcast %cst_50 : f32 to vector<8x128xf32>
    %133 = arith.subf %132, %131 : vector<8x128xf32>
    %134 = math.exp %133 : vector<8x128xf32>
    %135 = vector.broadcast %128 : vector<8x1xf32> to vector<8x128xf32>
    %136 = arith.mulf %135, %134 : vector<8x128xf32>
    %137 = arith.addf %126, %136 : vector<8x128xf32>
    %c96 = arith.constant 96 : index
    %c0_51 = arith.constant 0 : index
    %138 = vector.load %arg2[%c96, %c0_51] : memref<128x1xf32, #tpu.memory_space<vmem>>, vector<8x1xf32>
    %c96_52 = arith.constant 96 : index
    %c0_53 = arith.constant 0 : index
    %139 = vector.load %arg3[%c96_52, %c0_53] : memref<128x1xf32, #tpu.memory_space<vmem>>, vector<8x1xf32>
    %140 = vector.broadcast %138 : vector<8x1xf32> to vector<8x128xf32>
    %141 = arith.subf %140, %4 : vector<8x128xf32>
    %142 = arith.mulf %141, %141 : vector<8x128xf32>
    %cst_54 = arith.constant 0.000000e+00 : f32
    %143 = vector.broadcast %cst_54 : f32 to vector<8x128xf32>
    %144 = arith.subf %143, %142 : vector<8x128xf32>
    %145 = math.exp %144 : vector<8x128xf32>
    %146 = vector.broadcast %139 : vector<8x1xf32> to vector<8x128xf32>
    %147 = arith.mulf %146, %145 : vector<8x128xf32>
    %148 = arith.addf %137, %147 : vector<8x128xf32>
    %c104 = arith.constant 104 : index
    %c0_55 = arith.constant 0 : index
    %149 = vector.load %arg2[%c104, %c0_55] : memref<128x1xf32, #tpu.memory_space<vmem>>, vector<8x1xf32>
    %c104_56 = arith.constant 104 : index
    %c0_57 = arith.constant 0 : index
    %150 = vector.load %arg3[%c104_56, %c0_57] : memref<128x1xf32, #tpu.memory_space<vmem>>, vector<8x1xf32>
    %151 = vector.broadcast %149 : vector<8x1xf32> to vector<8x128xf32>
    %152 = arith.subf %151, %4 : vector<8x128xf32>
    %153 = arith.mulf %152, %152 : vector<8x128xf32>
    %cst_58 = arith.constant 0.000000e+00 : f32
    %154 = vector.broadcast %cst_58 : f32 to vector<8x128xf32>
    %155 = arith.subf %154, %153 : vector<8x128xf32>
    %156 = math.exp %155 : vector<8x128xf32>
    %157 = vector.broadcast %150 : vector<8x1xf32> to vector<8x128xf32>
    %158 = arith.mulf %157, %156 : vector<8x128xf32>
    %159 = arith.addf %148, %158 : vector<8x128xf32>
    %c112 = arith.constant 112 : index
    %c0_59 = arith.constant 0 : index
    %160 = vector.load %arg2[%c112, %c0_59] : memref<128x1xf32, #tpu.memory_space<vmem>>, vector<8x1xf32>
    %c112_60 = arith.constant 112 : index
    %c0_61 = arith.constant 0 : index
    %161 = vector.load %arg3[%c112_60, %c0_61] : memref<128x1xf32, #tpu.memory_space<vmem>>, vector<8x1xf32>
    %162 = vector.broadcast %160 : vector<8x1xf32> to vector<8x128xf32>
    %163 = arith.subf %162, %4 : vector<8x128xf32>
    %164 = arith.mulf %163, %163 : vector<8x128xf32>
    %cst_62 = arith.constant 0.000000e+00 : f32
    %165 = vector.broadcast %cst_62 : f32 to vector<8x128xf32>
    %166 = arith.subf %165, %164 : vector<8x128xf32>
    %167 = math.exp %166 : vector<8x128xf32>
    %168 = vector.broadcast %161 : vector<8x1xf32> to vector<8x128xf32>
    %169 = arith.mulf %168, %167 : vector<8x128xf32>
    %170 = arith.addf %159, %169 : vector<8x128xf32>
    %c120 = arith.constant 120 : index
    %c0_63 = arith.constant 0 : index
    %171 = vector.load %arg2[%c120, %c0_63] : memref<128x1xf32, #tpu.memory_space<vmem>>, vector<8x1xf32>
    %c120_64 = arith.constant 120 : index
    %c0_65 = arith.constant 0 : index
    %172 = vector.load %arg3[%c120_64, %c0_65] : memref<128x1xf32, #tpu.memory_space<vmem>>, vector<8x1xf32>
    %173 = vector.broadcast %171 : vector<8x1xf32> to vector<8x128xf32>
    %174 = arith.subf %173, %4 : vector<8x128xf32>
    %175 = arith.mulf %174, %174 : vector<8x128xf32>
    %cst_66 = arith.constant 0.000000e+00 : f32
    %176 = vector.broadcast %cst_66 : f32 to vector<8x128xf32>
    %177 = arith.subf %176, %175 : vector<8x128xf32>
    %178 = math.exp %177 : vector<8x128xf32>
    %179 = vector.broadcast %172 : vector<8x1xf32> to vector<8x128xf32>
    %180 = arith.mulf %179, %178 : vector<8x128xf32>
    %181 = arith.addf %170, %180 : vector<8x128xf32>
    %cst_67 = arith.constant dense<0.000000e+00> : vector<128xf32>
    %182 = vector.multi_reduction <add>, %181, %cst_67 [0] : vector<8x128xf32> to vector<128xf32>
    %183 = vector.shape_cast %182 : vector<128xf32> to vector<1x128xf32>
    %cst_68 = arith.constant 1.270000e+02 : f32
    %184 = vector.broadcast %cst_68 : f32 to vector<1x128xf32>
    %185 = arith.mulf %0, %184 : vector<1x128xf32>
    %cst_69 = arith.constant 5.000000e-01 : f32
    %186 = vector.broadcast %cst_69 : f32 to vector<1x128xf32>
    %187 = arith.addf %185, %186 : vector<1x128xf32>
    %188 = math.floor %187 : vector<1x128xf32>
    %cst_70 = arith.constant 0.556776464 : f32
    %189 = vector.broadcast %cst_70 : f32 to vector<1x128xf32>
    %190 = arith.mulf %188, %189 : vector<1x128xf32>
    %191 = arith.subf %190, %2 : vector<1x128xf32>
    %192 = arith.mulf %191, %191 : vector<1x128xf32>
    %cst_71 = arith.constant 0.000000e+00 : f32
    %193 = vector.broadcast %cst_71 : f32 to vector<1x128xf32>
    %194 = arith.subf %193, %192 : vector<1x128xf32>
    %195 = math.exp %194 : vector<1x128xf32>
    %cst_72 = arith.constant 39.8941879 : f32
    %196 = vector.broadcast %cst_72 : f32 to vector<1x128xf32>
    %197 = arith.mulf %196, %195 : vector<1x128xf32>
    %cst_73 = arith.constant 39.8941879 : f32
    %198 = vector.broadcast %cst_73 : f32 to vector<1x128xf32>
    %199 = arith.mulf %198, %183 : vector<1x128xf32>
    %cst_74 = arith.constant 9.99999993E-9 : f32
    %200 = vector.broadcast %cst_74 : f32 to vector<1x128xf32>
    %201 = arith.addf %197, %200 : vector<1x128xf32>
    %202 = arith.divf %199, %201 : vector<1x128xf32>
    %c0_75 = arith.constant 0 : index
    %c0_76 = arith.constant 0 : index
    %203 = vector.load %arg4[%c0_75, %c0_76] : memref<1x128xf32, #tpu.memory_space<vmem>>, vector<1x128xf32>
    tpu.vector_store %arg4[%c0_75, %c0_76], %202 {strides = array<i32>} : memref<1x128xf32, #tpu.memory_space<vmem>>, vector<1x128xf32>,
    return
  }
  func.func @transform_0(%arg0: i32) -> (i32, i32) {
    %c0_i32 = arith.constant 0 : i32
    %c0_i32_0 = arith.constant 0 : i32
    return %c0_i32, %arg0 : i32, i32
  }
  func.func @transform_1(%arg0: i32) -> (i32, i32) {
    %c0_i32 = arith.constant 0 : i32
    %c0_i32_0 = arith.constant 0 : i32
    %c0_i32_1 = arith.constant 0 : i32
    return %c0_i32, %c0_i32_0 : i32, i32
  }
  func.func @transform_2(%arg0: i32) -> (i32, i32) {
    %c0_i32 = arith.constant 0 : i32
    %c0_i32_0 = arith.constant 0 : i32
    %c0_i32_1 = arith.constant 0 : i32
    return %c0_i32, %c0_i32_0 : i32, i32
  }
  func.func @transform_3(%arg0: i32) -> (i32, i32) {
    %c0_i32 = arith.constant 0 : i32
    %c0_i32_0 = arith.constant 0 : i32
    return %c0_i32, %arg0 : i32, i32
  }
}

</mosaic_0001>

<bundles_post_ra>
// kernel: tpu_custom_call.1
= control target key start
LH: loop header
LB: loop body
LE: loop exit
PB: predicated region body
PF: predicated region fallthrough
CT: control target
= control target key end

     0   :  { %8 = vsyncpa [#allocation3], 0  ;;  %s960_s0 = inlined_call_operand.vmem [shape: f32[1,256], index: 0, kind: input, shape index: {}]   ;;  %s961_s1 = inlined_call_operand.vmem [shape: f32[128,1], index: 1, kind: input, shape index: {}]   ;;  %s962_s2 = inlined_call_operand.vmem [shape: f32[128,1], index: 2, kind: input, shape index: {}]   ;;  %s963_s3 = inlined_call_operand.hbm [shape: f32[1,256], index: 3, kind: output, shape index: {}]  }
   0x1   :  { %10 = vsyncpa [#allocation3 + $0x1], 0  ;;  %s740_s12 = smov 0   ;;  %s742_s13 = smov 0  }
   0x2   :  { %s744_s14 = smov 0   ;;  %s746_s15 = smov 0  }
   0x3 LB: > { %s761_s16 = sadd.s32 4294967295, %s717_s15   ;;  %s570_s17 = sadd.s32 4294967294, %s717_s15   ;;  %s717_s15 = sphi %s746_s15, %s969_s15   ;;  %s713_s14 = sphi %s744_s14, %s968_s14   ;;  %s709_s13 = sphi %s742_s13, %s967_s13   ;;  %s705_s12 = sphi %s740_s12, %s966_s12  }
   0x4   : > { %s765_s18 = sadd.s32 1, %s717_s15   ;;  %s91_s19 = sadd.s32 1, %s713_s14 }
   0x5   : > { %s88_s20 = ssub.s32 %s717_s15, %s765_s18  ;;  %p101_p0 = scmp.ne.s32.totalorder %s713_s14, %s709_s13 }
   0x6   : > { %p89_p1 = scmp.eq.s32.totalorder %s88_s20, 0  ;;  %p102_p2 = scmp.eq.s32.totalorder %s761_s16, 1 }
   0x7   : > { %p107_p3 = scmp.ne.s32.totalorder %s709_s13, %s705_s12  ;;  %p108_p4 = scmp.eq.s32.totalorder %s570_s17, 1 }
   0x8   : > { %s776_s21 = scalar_select %p89_p1, %s713_s14, %s91_s19  }
   0x9   : > { %p778_p5 = por %p102_p2, %p101_p0  ;;  %p782_p6 = por %p108_p4, %p107_p3 }
   0xa   : > { %p573_p7 = scmp.ge.s32.totalorder %s717_s15, 1  ;;  %p138_p8 = scmp.lt.s32.totalorder %s717_s15, 3 }
   0xc   : > { %p139_p9 = pnand %p573_p7, %p138_p8 }
   0xd   : > { %p159_p10 = scmp.lt.s32.totalorder (!%p139_p9), %s761_s16, 1  ;;  %s157_s11 = sand.u32 (!%p139_p9), 1, %s709_s13  }
   0xe   : > { %142 = sbr.rel (%p139_p9) target bundleno = 242 (0xf2), region = 32  ;;  %s514_s20 = scalar_lea.hbm (!%p139_p9), %s963_s3, %s761_s16 }
   0xf   : > { %s158_s24 = scalar_lea.vmem (!%p139_p9), [#allocation2], %s157_s11  ;;  %s518_s26 = sshll.u32 (!%p139_p9), %s514_s20, 4  ;;  %s519_s26 = int_to_ptr.hbm [resolvable:$true] %s518_s26 }
  0x10   : > { %s516_s25 = sshll.u32 (!%p139_p9), %s158_s24, 4  ;;  %s506_s27 = scalar_lea.sflag (!%p139_p9), [#allocation3], %s157_s11  ;;  %s517_s25 = int_to_ptr.vmem [resolvable:$true] %s516_s25 }
  0x11   : > { %s669_s28 = sshra.s32 (!%p139_p9), %s519_s26, 4  ;;  %s675_s4 = scalar_lea.hbm (!%p139_p9), %s963_s3, 2  ;;  %s670_s28 = int_to_ptr.hbm [resolvable:$true] %s669_s28 }
  0x12   : > { %s671_s29 = scalar_lea.hbm (!%p139_p9), %s670_s28, 1  ;;  %p676_p0 = scmp.lt.s32.totalorder (!%p139_p9), %s670_s28, %s963_s3 }
  0x13   : > { %v205_v0 = vld [vmem:[%s961_s1 + $0x10] sm:$0xff]  ;;  %v186_v1 = vld [vmem:[%s961_s1 + $0x8] sm:$0xff]  ;;  %v167_v2 = vld [vmem:[%s961_s1] sm:$0xff]  ;;  %v719_v3 = vmov 0   ;;  %s160_s7 = scalar_select %p159_p10, %s761_s16, 1 }
  0x14   : > { %618 = vset.pattern.permute.xlu2 %v719_v3  ;;  %617 = vset.pattern.permute.xlu1 %v719_v3  ;;  %v206_v4 = vld [vmem:[%s962_s2 + $0x10] sm:$0xff]  ;;  %v187_v5 = vld [vmem:[%s962_s2 + $0x8] sm:$0xff]  ;;  %v168_v6 = vld [vmem:[%s962_s2] sm:$0xff]  ;;  %p672_p11 = scmp.ne.s32.totalorder %s670_s28, %s671_s29  ;;  %p677_p1 = scmp.lt.s32.totalorder %s675_s4, %s671_s29 }
  0x15   : > { %616 = vset.pattern.permute.xlu0 %v719_v3  ;;  %209 = vperm.xlu2 %618, %v205_v0   ;;  %v243_v7 = vld [vmem:[%s961_s1 + $0x20] sm:$0xff]  ;;  %v225_v8 = vld [vmem:[%s962_s2 + $0x18] sm:$0xff]  ;;  %v263_v10 = vld [vmem:[%s962_s2 + $0x28] sm:$0xff]  ;;  %s161_s10 = scalar_lea.vmem %s960_s0, %s160_s7 }
  0x16   : > { %190 = vperm.xlu1 %617, %v186_v1   ;;  %171 = vperm.xlu0 %616, %v167_v2   ;;  %v224_v9 = vld [vmem:[%s961_s1 + $0x18] sm:$0xff]  ;;  %v262_v11 = vld [vmem:[%s961_s1 + $0x28] sm:$0xff]  ;;  %v244_v12 = vld [vmem:[%s962_s2 + $0x20] sm:$0xff]  ;;  %p673_p12 = pnand %p672_p11, %p778_p5  ;;  %p678_p2 = por %p677_p1, %p676_p0 }
  0x17   : > { %v300_v13 = vld [vmem:[%s961_s1 + $0x38] sm:$0xff]  ;;  %v282_v14 = vld [vmem:[%s962_s2 + $0x30] sm:$0xff]  ;;  %v320_v16 = vld [vmem:[%s962_s2 + $0x40] sm:$0xff] }
  0x18   : > { %v281_v15 = vld [vmem:[%s961_s1 + $0x30] sm:$0xff]  ;;  %v319_v17 = vld [vmem:[%s961_s1 + $0x40] sm:$0xff]  ;;  %v301_v18 = vld [vmem:[%s962_s2 + $0x38] sm:$0xff]  ;;  %p674_p13 = pneg %p673_p12 }
  0x19   : > { %v376_v19 = vld [vmem:[%s961_s1 + $0x58] sm:$0xff]  ;;  %v357_v20 = vld [vmem:[%s961_s1 + $0x50] sm:$0xff]  ;;  %v338_v21 = vld [vmem:[%s961_s1 + $0x48] sm:$0xff] }
  0x1a   : > { %v433_v22 = vld [vmem:[%s961_s1 + $0x70] sm:$0xff]  ;;  %v414_v23 = vld [vmem:[%s961_s1 + $0x68] sm:$0xff]  ;;  %v395_v24 = vld [vmem:[%s961_s1 + $0x60] sm:$0xff]  ;;  %p679_p3 = pnand %p678_p2, %p674_p13 }
  0x1b   : > { %v358_v25 = vld [vmem:[%s962_s2 + $0x50] sm:$0xff]  ;;  %v339_v26 = vld [vmem:[%s962_s2 + $0x48] sm:$0xff]  ;;  %v452_v27 = vld [vmem:[%s961_s1 + $0x78] sm:$0xff] }
  0x1c   : > { %v415_v28 = vld [vmem:[%s962_s2 + $0x68] sm:$0xff]  ;;  %v396_v29 = vld [vmem:[%s962_s2 + $0x60] sm:$0xff]  ;;  %v377_v30 = vld [vmem:[%s962_s2 + $0x58] sm:$0xff] }
  0x1d   : > { %219 = vperm.xlu2 %618, %v206_v4   ;;  %v453_v31 = vld [vmem:[%s962_s2 + $0x78] sm:$0xff]  ;;  %v434_v32 = vld [vmem:[%s962_s2 + $0x70] sm:$0xff]  ;;  %v162_v38 = vld [vmem:[%s161_s10] sm:$0x1] }
  0x1e   : > { %200 = vperm.xlu1 %617, %v187_v5   ;;  %181 = vperm.xlu0 %616, %v168_v6   ;;  %v163_v41 = vmul.f32 70.71061, %v162_v38  ;;  %v477_v57 = vmul.f32 127.0, %v162_v38 }
  0x20   : > { %v893_v43 = vperm.slane %v163_v41, 0  ;;  %v478_v60 = vadd.f32 0.5, %v477_v57 }
  0x22   : > { %v479_v0 = vfloor.f32 %v478_v60 }
  0x24   : > { %v480_v6 = vmul.f32 0.55677646, %v479_v0 }
  0x25   : > { %247 = vperm.xlu2 %618, %v243_v7  }
  0x26   : > { %238 = vperm.xlu1 %617, %v225_v8   ;;  %228 = vperm.xlu0 %616, %v224_v9  }
  0x2d   : > { %276 = vperm.xlu2 %618, %v263_v10  }
  0x2e   : > { %266 = vperm.xlu1 %617, %v262_v11   ;;  %257 = vperm.xlu0 %616, %v244_v12  }
  0x35   : > { %304 = vperm.xlu2 %618, %v300_v13  }
  0x36   : > { %295 = vperm.xlu1 %617, %v282_v14   ;;  %285 = vperm.xlu0 %616, %v281_v15   ;;  %v481_v14 = vsub.f32 %v480_v6, %v163_v41 }
  0x3d   : > { %333 = vperm.xlu2 %618, %v320_v16  }
  0x3e   : > { %323 = vperm.xlu1 %617, %v319_v17   ;;  %314 = vperm.xlu0 %616, %v301_v18  }
  0x45   : > { %380 = vperm.xlu2 %618, %v376_v19  }
  0x46   : > { %361 = vperm.xlu1 %617, %v357_v20   ;;  %342 = vperm.xlu0 %616, %v338_v21  }
  0x4d   : > { %437 = vperm.xlu2 %618, %v433_v22  }
  0x4e   : > { %418 = vperm.xlu1 %617, %v414_v23   ;;  %399 = vperm.xlu0 %616, %v395_v24   ;;  %v482_v23 = vmul.f32 %v481_v14, %v481_v14 }
  0x55   : > { %371 = vperm.xlu2 %618, %v358_v25  }
  0x56   : > { %352 = vperm.xlu1 %617, %v339_v26   ;;  %456 = vperm.xlu0 %616, %v452_v27  }
  0x5d   : > { %428 = vperm.xlu2 %618, %v415_v28  }
  0x5e   : > { %409 = vperm.xlu1 %617, %v396_v29   ;;  %390 = vperm.xlu0 %616, %v377_v30  }
  0x66   : > { %466 = vperm.xlu1 %617, %v453_v31   ;;  %447 = vperm.xlu0 %616, %v434_v32  }
  0x6f   : > { %v210_v33 = vpop.permute.xlu2 %209 }
  0x70   : > { %v212_v50 = vsub.f32 %v210_v33, %v893_v43  ;;  %v483_v33 = vsub.f32 0.0, %v482_v23 }
  0x72   : > { %v213_v58 = vmul.f32 %v212_v50, %v212_v50 }
  0x74   : > { %v214_v1 = vsub.f32 0.0, %v213_v58 }
  0x76   : > { %v215_v10 = vmul.f32 1.442695, %v214_v1 }
  0x77   : > { %v884_v34 = vpop.permute.xlu2 %219 }
  0x7f   : > { %v248_v37 = vpop.permute.xlu2 %247 }
  0x80   : > { %v250_v2 = vsub.f32 %v248_v37, %v893_v43 }
  0x82   : > { %v251_v11 = vmul.f32 %v250_v2, %v250_v2 }
  0x84   : > { %v252_v17 = vsub.f32 0.0, %v251_v11 }
  0x86   : > { %v253_v26 = vmul.f32 1.442695, %v252_v17 }
  0x87   : > { %v891_v42 = vpop.permute.xlu2 %276 }
  0x88   : > { %v191_v35 = vpop.permute.xlu1 %190  ;;  %v172_v36 = vpop.permute.xlu0 %171 }
  0x89   : > { %v193_v46 = vsub.f32 %v191_v35, %v893_v43  ;;  %v174_v47 = vsub.f32 %v172_v36, %v893_v43 }
  0x8b   : > { %v194_v48 = vmul.f32 %v193_v46, %v193_v46  ;;  %v175_v49 = vmul.f32 %v174_v47, %v174_v47 }
  0x8d   : > { %v195_v55 = vsub.f32 0.0, %v194_v48  ;;  %v176_v56 = vsub.f32 0.0, %v175_v49  ;;  %v484_v48 = vmul.f32 1.442695, %v483_v33 }
  0x8f   : > { %v305_v51 = vpop.permute.xlu2 %304  ;;  %v196_v61 = vmul.f32 1.442695, %v195_v55  ;;  %v177_v62 = vmul.f32 1.442695, %v176_v56 }
  0x90   : > { %v201_v39 = vpop.permute.xlu1 %200  ;;  %v182_v40 = vpop.permute.xlu0 %181  ;;  %v307_v19 = vsub.f32 %v305_v51, %v893_v43 }
  0x91   : > { %619 = vpow2.f32 %v196_v61 }
  0x92   : > { %621 = vpow2.f32 %v177_v62  ;;  %v308_v31 = vmul.f32 %v307_v19, %v307_v19 }
  0x93   : > { %623 = vpow2.f32 %v215_v10 }
  0x94   : > { %v309_v41 = vsub.f32 0.0, %v308_v31 }
  0x96   : > { %v310_v57 = vmul.f32 1.442695, %v309_v41 }
  0x97   : > { %v907_v7 = vpop.permute.xlu2 %333  ;;  %v620_v16 = vpop.eup %619 }
  0x98   : > { %v895_v44 = vpop.permute.xlu1 %238  ;;  %v229_v45 = vpop.permute.xlu0 %228  ;;  %v203_v27 = vmul.f32 %v620_v16, %v201_v39 }
  0x99   : > { %v231_v52 = vsub.f32 %v229_v45, %v893_v43  ;;  %v622_v18 = vpop.eup %621 }
  0x9a   : > { %v184_v28 = vmul.f32 %v622_v18, %v182_v40  ;;  %v624_v35 = vpop.eup %623 }
  0x9b   : > { %v232_v59 = vmul.f32 %v231_v52, %v231_v52  ;;  %v222_v39 = vmul.f32 %v624_v35, %v884_v34 }
  0x9c   : > { %v204_v38 = vadd.f32 %v203_v27, %v184_v28 }
  0x9d   : > { %v233_v3 = vsub.f32 0.0, %v232_v59 }
  0x9e   : > { %v223_v52 = vadd.f32 %v222_v39, %v204_v38 }
  0x9f   : > { %v234_v12 = vmul.f32 1.442695, %v233_v3  ;;  %v381_v29 = vpop.permute.xlu2 %380 }
  0xa0   : > { %v267_v53 = vpop.permute.xlu1 %266  ;;  %v901_v54 = vpop.permute.xlu0 %257  ;;  %v383_v45 = vsub.f32 %v381_v29, %v893_v43 }
  0xa1   : > { %v269_v63 = vsub.f32 %v267_v53, %v893_v43  ;;  %625 = vpow2.f32 %v234_v12 }
  0xa2   : > { %v384_v58 = vmul.f32 %v383_v45, %v383_v45 }
  0xa3   : > { %v270_v9 = vmul.f32 %v269_v63, %v269_v63 }
  0xa4   : > { %v385_v2 = vsub.f32 0.0, %v384_v58 }
  0xa5   : > { %v271_v15 = vsub.f32 0.0, %v270_v9 }
  0xa6   : > { %v386_v16 = vmul.f32 1.442695, %v385_v2 }
  0xa7   : > { %v272_v25 = vmul.f32 1.442695, %v271_v15  ;;  %v626_v36 = vpop.eup %625  ;;  %v438_v61 = vpop.permute.xlu2 %437 }
  0xa8   : > { %v905_v4 = vpop.permute.xlu1 %295  ;;  %v286_v5 = vpop.permute.xlu0 %285  ;;  %v241_v40 = vmul.f32 %v626_v36, %v895_v44  ;;  %v440_v3 = vsub.f32 %v438_v61, %v893_v43 }
  0xa9   : > { %v288_v8 = vsub.f32 %v286_v5, %v893_v43  ;;  %627 = vpow2.f32 %v272_v25 }
  0xaa   : > { %629 = vpow2.f32 %v253_v26  ;;  %v242_v60 = vadd.f32 %v241_v40, %v223_v52  ;;  %v441_v17 = vmul.f32 %v440_v3, %v440_v3 }
  0xab   : > { %v289_v13 = vmul.f32 %v288_v8, %v288_v8 }
  0xac   : > { %v442_v27 = vsub.f32 0.0, %v441_v17 }
  0xad   : > { %v290_v20 = vsub.f32 0.0, %v289_v13 }
  0xaf   : > { %v291_v32 = vmul.f32 1.442695, %v290_v20  ;;  %v628_v56 = vpop.eup %627  ;;  %v372_v41 = vpop.permute.xlu2 %371 }
  0xb0   : > { %v324_v21 = vpop.permute.xlu1 %323  ;;  %v911_v22 = vpop.permute.xlu0 %314  ;;  %v279_v0 = vmul.f32 %v628_v56, %v891_v42 }
  0xb1   : > { %v326_v24 = vsub.f32 %v324_v21, %v893_v43  ;;  %631 = vpow2.f32 %v291_v32  ;;  %v630_v59 = vpop.eup %629 }
  0xb2   : > { %633 = vpow2.f32 %v484_v48  ;;  %v260_v44 = vmul.f32 %v630_v59, %v901_v54 }
  0xb3   : > { %v327_v30 = vmul.f32 %v326_v24, %v326_v24 }
  0xb4   : > { %v261_v8 = vadd.f32 %v260_v44, %v242_v60 }
  0xb5   : > { %v328_v37 = vsub.f32 0.0, %v327_v30 }
  0xb6   : > { %v280_v54 = vadd.f32 %v279_v0, %v261_v8 }
  0xb7   : > { %v329_v51 = vmul.f32 1.442695, %v328_v37  ;;  %v632_v63 = vpop.eup %631 }
  0xb8   : > { %v362_v46 = vpop.permute.xlu1 %361  ;;  %v343_v47 = vpop.permute.xlu0 %342  ;;  %v298_v9 = vmul.f32 %v632_v63, %v905_v4 }
  0xb9   : > { %v364_v49 = vsub.f32 %v362_v46, %v893_v43  ;;  %v345_v50 = vsub.f32 %v343_v47, %v893_v43  ;;  %635 = vpow2.f32 %v329_v51  ;;  %v634_v12 = vpop.eup %633 }
  0xba   : > { %637 = vpow2.f32 %v310_v57  ;;  %v299_v18 = vadd.f32 %v298_v9, %v280_v54  ;;  %v486_v20 = vmul.f32 39.894188, %v634_v12  ;;  %v429_v57 = vpop.permute.xlu2 %428 }
  0xbb   : > { %v365_v53 = vmul.f32 %v364_v49, %v364_v49  ;;  %v346_v55 = vmul.f32 %v345_v50, %v345_v50 }
  0xbc   : > { %v488_v33 = vadd.f32 1e-08, %v486_v20 }
  0xbd   : > { %v347_v62 = vsub.f32 0.0, %v346_v55  ;;  %v366_v34 = vsub.f32 0.0, %v365_v53 }
  0xbe   : > { %vm494_vm0 = vweird.f32 %v488_v33  ;;  %v500_v9 = vand.u32 2147483648, %v488_v33  ;;  %v498_v12 = vand.u32 2147483647, %v488_v33 }
  0xbf   : > { %v348_v1 = vmul.f32 1.442695, %v347_v62  ;;  %v367_v13 = vmul.f32 1.442695, %v366_v34  ;;  %v636_v15 = vpop.eup %635 }
  0xc0   : > { %v419_v5 = vpop.permute.xlu1 %418  ;;  %v400_v6 = vpop.permute.xlu0 %399  ;;  %v336_v25 = vmul.f32 %v636_v15, %v907_v7  ;;  %v501_v54 = vor.u32 1.1754944e-38, %v500_v9  ;;  %vm499_vm3 = vcmp.eq.f32.partialorder %v498_v12, 8.507059e+37 }
  0xc1   : > { %v421_v10 = vsub.f32 %v419_v5, %v893_v43  ;;  %v402_v11 = vsub.f32 %v400_v6, %v893_v43  ;;  %639 = vpow2.f32 %v348_v1  ;;  %v638_v21 = vpop.eup %637 }
  0xc2   : > { %641 = vpow2.f32 %v367_v13  ;;  %v317_v4 = vmul.f32 %v638_v21, %v911_v22  ;;  %v443_v22 = vmul.f32 1.442695, %v442_v27 }
  0xc3   : > { %v422_v14 = vmul.f32 %v421_v10, %v421_v10  ;;  %v403_v42 = vmul.f32 %v402_v11, %v402_v11  ;;  %643 = vpow2.f32 %v386_v16 }
  0xc4   : > { %v318_v30 = vadd.f32 %v317_v4, %v299_v18 }
  0xc5   : > { %v404_v19 = vsub.f32 0.0, %v403_v42  ;;  %v423_v23 = vsub.f32 0.0, %v422_v14 }
  0xc6   : > { %v337_v36 = vadd.f32 %v336_v25, %v318_v30 }
  0xc7   : > { %v405_v24 = vmul.f32 1.442695, %v404_v19  ;;  %v640_v26 = vpop.eup %639  ;;  %v424_v35 = vmul.f32 1.442695, %v423_v23 }
  0xc8   : > { %v353_v28 = vpop.permute.xlu1 %352  ;;  %v457_v29 = vpop.permute.xlu0 %456 }
  0xc9   : > { %v355_v31 = vmul.f32 %v640_v26, %v353_v28  ;;  %v459_v32 = vsub.f32 %v457_v29, %v893_v43  ;;  %645 = vpow2.f32 %v405_v24  ;;  %v642_v38 = vpop.eup %641 }
  0xca   : > { %647 = vrcp.f32 %v488_v33  ;;  %v644_v7 = vpop.eup %643  ;;  %v374_v48 = vmul.f32 %v642_v38, %v372_v41 }
  0xcb   : > { %v460_v37 = vmul.f32 %v459_v32, %v459_v32  ;;  %v356_v45 = vadd.f32 %v355_v31, %v337_v36  ;;  %649 = vpow2.f32 %v424_v35 }
  0xcc   : > { %651 = vpow2.f32 %v443_v22 }
  0xcd   : > { %v461_v46 = vsub.f32 0.0, %v460_v37  ;;  %v375_v43 = vadd.f32 %v374_v48, %v356_v45 }
  0xcf   : > { %v462_v47 = vmul.f32 1.442695, %v461_v46  ;;  %v646_v39 = vpop.eup %645 }
  0xd0   : > { %v410_v40 = vpop.permute.xlu1 %409  ;;  %v391_v49 = vpop.permute.xlu0 %390 }
  0xd1   : > { %v393_v50 = vmul.f32 %v644_v7, %v391_v49  ;;  %653 = vpow2.f32 %v462_v47  ;;  %v648_v51 = vpop.eup %647  ;;  %v412_v52 = vmul.f32 %v646_v39, %v410_v40 }
  0xd2   : > { %v650_v55 = vpop.eup %649  ;;  %v490_v60 = vmul.f32 %v648_v51, %v488_v33  ;;  %vm495_vm1 = vweird.f32 %v648_v51 }
  0xd3   : > { %v394_v53 = vadd.f32 %v393_v50, %v375_v43  ;;  %v652_v58 = vpop.eup %651  ;;  %v431_v59 = vmul.f32 %v650_v55, %v429_v57  ;;  %vm496_vm2 = vmor %vm494_vm0, %vm495_vm1 }
  0xd4   : > { %v491_v2 = vsub.f32 1.0, %v490_v60 }
  0xd5   : > { %v413_v56 = vadd.f32 %v412_v52, %v394_v53 }
  0xd6   : > { %v492_v6 = vmul.f32 %v648_v51, %v491_v2 }
  0xd7   : > { %v654_v61 = vpop.eup %653  ;;  %v432_v34 = vadd.f32 %v431_v59, %v413_v56 }
  0xd8   : > { %v467_v62 = vpop.permute.xlu1 %466  ;;  %v448_v63 = vpop.permute.xlu0 %447  ;;  %v493_v11 = vadd.f32 %v648_v51, %v492_v6 }
  0xd9   : > { %v450_v44 = vmul.f32 %v652_v58, %v448_v63  ;;  %v469_v0 = vmul.f32 %v654_v61, %v467_v62 }
  0xda   : > { %v497_v42 = vsel %vm496_vm2, %v648_v51, %v493_v11 }
  0xdb   : > { %v451_v1 = vadd.f32 %v450_v44, %v432_v34  ;;  %v502_v16 = vsel %vm499_vm3, %v501_v54, %v497_v42 }
  0xdd   : > { %v470_v3 = vadd.f32 %v469_v0, %v451_v1 }
  0xdf   : > { %v471_v5 = vrot.slane %v470_v3, 4 }
  0xe1   : > { %v472_v8 = vadd.f32 %v471_v5, %v470_v3 }
  0xe3   : > { %v473_v10 = vrot.slane %v472_v8, 2 }
  0xe5   : > { %v474_v13 = vadd.f32 %v473_v10, %v472_v8 }
  0xe7   : > { %v475_v14 = vrot.slane %v474_v13, 1 }
  0xe9   : > { %v476_v15 = vadd.f32 %v475_v14, %v474_v13 }
  0xeb   : > { %v487_v17 = vmul.f32 39.894188, %v476_v15 }
  0xed   : > { %v503_v18 = vmul.f32 %v502_v16, %v487_v17 }
  0xef   : > { %504 = vst [vmem:[%s158_s24] sm:$0x1] %v503_v18 }
  0xf0   : > { %682 = shalt.err (!%p679_p3)
}
  0xf1   : > { %576 = dma.vmem_to_hbm [thread:$0]  (%p778_p5), %s517_s25, 16, %s519_s26, %s506_s27  }
  0xf2 PF: > { %p582_p4 = scmp.ge.s32.totalorder %s717_s15, 2  ;;  %s530_s7 = sand.u32 1, %s705_s12  }
  0xf3   : > { %s531_s8 = scalar_lea.sflag [#allocation3], %s530_s7 }
  0xf4   : > { %p579_p7 = pnand %p582_p4, %p782_p6 }
  0xf6   : > { %p580_p8 = pneg %p579_p7 }
  0xf8   : > { %700 = dma.done.wait (%p580_p8), %s531_s8, 16  }
  0xf9   : > { %702 = vsyncadd (%p580_p8), %s531_s8, 4294967280  ;;  %p13_p9 = scmp.ge.s32.totalorder %s765_s18, 4   ;;  %s966_s12 = smov %s709_s13 }
  0xfa   : > { %s967_s13 = smov %s713_s14  ;;  %s968_s14 = smov %s776_s21 }
  0xfb   : > { %s969_s15 = smov %s765_s18  ;;  %15 = sbr.rel (!%p13_p9) target bundleno = 3 (0x3), region = 67 }
 0x100   :  { %536 = vsyncpa [#allocation3], 1 }
 0x101   :  { %538 = vsyncpa [#allocation3 + $0x1], 1 }

</bundles_post_ra>
